<compile_context>
chip_gen: v6e
topology: v6e:2x2x1
jax: 0.10.0
libtpu: 0.0.40
codegen_flags: <defaults>
</compile_context>

<pallas_src>
import functools
import math

import jax
import jax.numpy as jnp
from jax import lax
from jax.experimental import pallas as pl
from jax.experimental.pallas import tpu as pltpu


def _pair(v):
    return tuple(v) if isinstance(v, (tuple, list)) else (v, v)


def _cdiv(a, b):
    return -(-a // b)


# ----------------------------- Pallas kernel ------------------------------ #
def _fused_complex_conv_kernel(p_ref, w_ref, b_ref, o_ref, acc_ref):
    # grid = (M tiles [parallel], K tiles [arbitrary]); K is the reduction axis.
    kk = pl.program_id(1)

    @pl.when(kk == 0)
    def _init():
        acc_ref[...] = jnp.zeros_like(acc_ref)

    # One fused MXU matmul per K slab: (2C_out, tk) @ (tk, tm) -> f32 accumulate.
    acc_ref[...] += jnp.dot(w_ref[...], p_ref[...],
                            preferred_element_type=jnp.float32)

    @pl.when(kk == pl.num_programs(1) - 1)
    def _finalize():
        # Bias broadcasts along lanes; output tile is lane-dense (last dim = tm).
        o_ref[...] = (acc_ref[...] + b_ref[...]).astype(o_ref.dtype)


# ------------------------------- glue (JAX) -------------------------------- #
def _im2col_T(x, kernel_size, stride, padding, dilation):
    """x: (N, C, H, W) -> (C*kh*kw, N*Ho*Wo); row order (C, kh, kw), col (N,Ho,Wo)."""
    kh, kw = kernel_size
    sh, sw = stride
    ph, pw = padding
    dh, dw = dilation
    n, c, h, w = x.shape
    xp = jnp.pad(x, ((0, 0), (0, 0), (ph, ph), (pw, pw)))
    hp, wp = h + 2 * ph, w + 2 * pw
    ho = (hp - dh * (kh - 1) - 1) // sh + 1
    wo = (wp - dw * (kw - 1) - 1) // sw + 1
    cols = []
    for i in range(kh):
        for j in range(kw):
            patch = xp[:, :,
                       i * dh: i * dh + (ho - 1) * sh + 1: sh,
                       j * dw: j * dw + (wo - 1) * sw + 1: sw]  # (N, C, Ho, Wo)
            cols.append(patch)
    cols = jnp.stack(cols, axis=2)              # (N, C, kh*kw, Ho, Wo)
    cols = cols.transpose(1, 2, 0, 3, 4)        # (C, kh*kw, N, Ho, Wo)
    return cols.reshape(c * kh * kw, n * ho * wo), ho, wo


def _vmem_budget_bytes():
    """Per-generation usable VMEM budget for this kernel's buffers."""
    cap = None
    try:
        cap = int(pltpu.get_tpu_info().vmem_capacity_bytes)
    except Exception:
        cap = None
    if cap is None or cap <= 0:
        cap = 64 * 1024 * 1024                      # conservative (v7x per-core)
    # Headroom for Mosaic internals / semaphores; cap the usable slice on v5e/v6e.
    return max(8 * 1024 * 1024, min(cap - 16 * 1024 * 1024, 100 * 1024 * 1024))


def _vmem_need(tm, tk, c2, in_itemsize, out_itemsize):
    return (2 * tk * tm * in_itemsize        # double-buffered patch tiles
            + 2 * c2 * tk * in_itemsize      # double-buffered weight K-slabs
            + 2 * c2 * tm * out_itemsize     # double-buffered output tiles
            + c2 * tm * 4                    # f32 accumulator scratch
            + 2 * c2 * 4)                    # bias


def _select_tiles(m, k2, c2, in_itemsize, out_itemsize, budget, *, k_tile=None,
                  max_tm=1024, min_m_steps=4):
    """Pick (tm, tk).

    tm: largest multiple of 128 (<= max_tm) leaving >= min_m_steps grid steps on
    the parallel M axis (>= 2 steps per v7x TensorCore keeps DMA overlapped).
    tk: whole reduction if it fits the VMEM budget, else the largest multiple of
    128 that does (handled by the K grid axis + accumulator in the kernel).
    """
    tm = max_tm
    while tm > 128 and _cdiv(m, tm) < min_m_steps:
        tm //= 2

    def pick_tk(tm_):
        if k_tile is not None:
            return k_tile
        if _vmem_need(tm_, k2, c2, in_itemsize, out_itemsize) <= budget:
            return k2                           # whole reduction resident, no K pad
        for cand in (2048, 1024, 512, 256, 128):
            if cand < k2 and _vmem_need(tm_, cand, c2, in_itemsize,
                                        out_itemsize) <= budget:
                return cand
        return None

    tk = pick_tk(tm)
    while tk is None and tm > 128:
        tm //= 2
        tk = pick_tk(tm)
    if tk is None:
        tk = min(k2, 128)                       # last resort; vmem limit raised below
    return tm, tk


def complex_conv2d(x, w_r, w_i, bias=None, *, stride=1, padding=0, dilation=1,
                   compute_dtype=jnp.bfloat16, k_tile=None):
    """x: (N, C_in, H, W, 2); w_r/w_i: (C_out, C_in, kh, kw); bias: (C_out, 2)."""
    assert x.ndim == 5 and x.shape[-1] == 2
    stride, padding, dilation = _pair(stride), _pair(padding), _pair(dilation)
    # TODO(synk): groups > 1 (grouped conv) not supported — would need a
    # block-diagonal fused weight or a per-group grid axis.

    n, c_in, h, w = x.shape[:4]
    c_out, _, kh, kw = w_r.shape
    k_in = c_in * kh * kw
    k2, c2 = 2 * k_in, 2 * c_out

    if bias is None:
        bias = jnp.zeros((c_out, 2), jnp.float32)

    # Real/imag concatenated along channels, cast to compute dtype FIRST so the big
    # patch matrix is materialized once, already narrow (no later pad+cast pass).
    x2 = jnp.concatenate([x[..., 0], x[..., 1]], axis=1).astype(compute_dtype)
    p_t, ho, wo = _im2col_T(x2, (kh, kw), stride, padding, dilation)   # (2K, M)
    m = n * ho * wo

    # Fused complex weight (transposed): rows [0:C_out] -> real out, [C_out:] -> imag.
    wr_f = w_r.reshape(c_out, k_in).astype(jnp.float32)
    wi_f = w_i.reshape(c_out, k_in).astype(jnp.float32)
    w2t = jnp.concatenate(
        [jnp.concatenate([wr_f, -wi_f], axis=1),
         jnp.concatenate([wi_f, wr_f], axis=1)], axis=0)               # (2*C_out, 2K)
    b2 = jnp.concatenate([bias[:, 0], bias[:, 1]]
                         ).reshape(c2, 1).astype(jnp.float32)          # (2*C_out, 1)

    # VMEM-budget-aware tile selection (per TPU generation).
    in_itemsize = jnp.dtype(compute_dtype).itemsize
    out_itemsize = 4
    budget = _vmem_budget_bytes()
    tm, tk = _select_tiles(m, k2, c2, in_itemsize, out_itemsize, budget,
                           k_tile=k_tile)

    m_pad = _cdiv(m, tm) * tm
    k2_pad = _cdiv(k2, tk) * tk

    # Zero padding of K/M: padded rows/cols contribute nothing to the accumulation.
    p_t = jnp.pad(p_t, ((0, k2_pad - k2), (0, m_pad - m)))
    w2t = jnp.pad(w2t, ((0, 0), (0, k2_pad - k2))).astype(compute_dtype)

    grid = (m_pad // tm, k2_pad // tk)         # reduction axis last ("arbitrary")

    est = _vmem_need(tm, tk, c2, in_itemsize, out_itemsize)
    cp_kwargs = dict(dimension_semantics=("parallel", "arbitrary"))
    if est > 12 * 1024 * 1024:
        # Never request the whole physical VMEM of a core (v7x is 64 MiB total).
        cp_kwargs["vmem_limit_bytes"] = int(
            max(min(2 * est, budget), int(1.25 * est)))

    cost = pl.CostEstimate(
        flops=int(2 * c2 * k2_pad * m_pad),
        transcendentals=0,
        bytes_accessed=int(k2_pad * m_pad * in_itemsize             # patches, once
                           + grid[0] * c2 * k2_pad * in_itemsize    # weights per M tile
                           + c2 * m_pad * out_itemsize))            # output writeback

    out2 = pl.pallas_call(
        _fused_complex_conv_kernel,
        out_shape=jax.ShapeDtypeStruct((c2, m_pad), jnp.float32),
        grid_spec=pltpu.PrefetchScalarGridSpec(
            num_scalar_prefetch=0,
            grid=grid,
            in_specs=[
                pl.BlockSpec((tk, tm), lambda i, kk: (kk, i)),   # patch tile
                pl.BlockSpec((c2, tk), lambda i, kk: (0, kk)),   # fused weight K-slab
                pl.BlockSpec((c2, 1), lambda i, kk: (0, 0)),     # fused bias
            ],
            out_specs=pl.BlockSpec((c2, tm), lambda i, kk: (0, i)),
            scratch_shapes=[pltpu.VMEM((c2, tm), jnp.float32)],  # f32 accumulator
        ),
        compiler_params=pltpu.CompilerParams(**cp_kwargs),
        cost_estimate=cost,
    )(p_t, w2t, b2)

    # (2*C_out, M) -> (N, C_out, Ho, Wo, 2): single reshape + transpose, no stack.
    out = out2[:, :m].reshape(2, c_out, n, ho, wo).transpose(2, 1, 3, 4, 0)
    return out


# ---------------------------- pure-JAX reference --------------------------- #
def _ref_complex_conv2d(x, w_r, w_i, bias, stride, padding, dilation):
    def conv(inp, wgt):
        return lax.conv_general_dilated(
            inp, wgt, window_strides=stride,
            padding=[(padding[0], padding[0]), (padding[1], padding[1])],
            rhs_dilation=dilation,
            dimension_numbers=("NCHW", "OIHW", "NCHW"))
    x_r, x_i = x[..., 0], x[..., 1]
    o_r = conv(x_r, w_r) - conv(x_i, w_i) + bias[:, 0][None, :, None, None]
    o_i = conv(x_i, w_r) + conv(x_r, w_i) + bias[:, 1][None, :, None, None]
    return jnp.stack([o_r, o_i], axis=-1)


# ---------------------------------- main ----------------------------------- #
if __name__ == "__main__":
    # ---- config 1: module defaults (kernel 3, stride 1, pad 0, dil 1) -------
    in_channels, out_channels = 4, 8
    kernel_size, stride, padding, dilation = (3, 3), (1, 1), (0, 0), (1, 1)
    N, H, W = 2, 16, 16

    key = jax.random.PRNGKey(0)
    k_x, k_wr, k_wi, k_b = jax.random.split(key, 4)

    fan_in = in_channels * kernel_size[0] * kernel_size[1]
    bound_w = 1.0 / math.sqrt(fan_in)
    w_r = jax.random.uniform(
        k_wr, (out_channels, in_channels, *kernel_size),
        minval=-bound_w, maxval=bound_w, dtype=jnp.float32)
    w_i = jax.random.uniform(
        k_wi, (out_channels, in_channels, *kernel_size),
        minval=-bound_w, maxval=bound_w, dtype=jnp.float32)
    bias = jax.random.uniform(
        k_b, (out_channels, 2), minval=-bound_w, maxval=bound_w,
        dtype=jnp.float32)
    x = jax.random.normal(k_x, (N, in_channels, H, W, 2), dtype=jnp.float32)

    fwd_f32 = jax.jit(functools.partial(
        complex_conv2d, stride=stride, padding=padding, dilation=dilation,
        compute_dtype=jnp.float32))
    fwd_bf16 = jax.jit(functools.partial(        # default compute dtype is bf16
        complex_conv2d, stride=stride, padding=padding, dilation=dilation))

    ref = jax.block_until_ready(
        _ref_complex_conv2d(x, w_r, w_i, bias, stride, padding, dilation))

    out = jax.block_until_ready(fwd_f32(x, w_r, w_i, bias))
    assert out.shape == (N, out_channels, H - 2, W - 2, 2), out.shape
    assert jnp.allclose(out, ref, atol=1e-4, rtol=1e-4), float(
        jnp.max(jnp.abs(out - ref)))

    # bf16 operands (v5e/v6e/v7x MXU-native, half DMA bytes), f32 accumulation.
    out_bf16 = jax.block_until_ready(fwd_bf16(x, w_r, w_i, bias))
    assert jnp.allclose(out_bf16, ref, atol=3e-1, rtol=3e-2), float(
        jnp.max(jnp.abs(out_bf16 - ref)))

    # ---- config 2: exercise the K-tiled accumulator path + stride/pad/dil ----
    in2, outc2 = 16, 6
    ks2, st2, pd2, dl2 = (3, 3), (1, 1), (2, 2), (2, 2)
    N2, H2, W2 = 2, 16, 16
    k_x2, k_wr2, k_wi2, k_b2 = jax.random.split(jax.random.PRNGKey(1), 4)
    fan_in2 = in2 * ks2[0] * ks2[1]
    bw2 = 1.0 / math.sqrt(fan_in2)
    w_r2 = jax.random.uniform(k_wr2, (outc2, in2, *ks2),
                              minval=-bw2, maxval=bw2, dtype=jnp.float32)
    w_i2 = jax.random.uniform(k_wi2, (outc2, in2, *ks2),
                              minval=-bw2, maxval=bw2, dtype=jnp.float32)
    bias2 = jax.random.uniform(k_b2, (outc2, 2),
                               minval=-bw2, maxval=bw2, dtype=jnp.float32)
    x_b = jax.random.normal(k_x2, (N2, in2, H2, W2, 2), dtype=jnp.float32)

    fwd_ktile = jax.jit(functools.partial(
        complex_conv2d, stride=st2, padding=pd2, dilation=dl2,
        compute_dtype=jnp.float32, k_tile=128))   # force 3 K grid steps (2K=288)
    ref2 = jax.block_until_ready(
        _ref_complex_conv2d(x_b, w_r2, w_i2, bias2, st2, pd2, dl2))
    out_k = jax.block_until_ready(fwd_ktile(x_b, w_r2, w_i2, bias2))
    assert out_k.shape == ref2.shape, (out_k.shape, ref2.shape)
    assert jnp.allclose(out_k, ref2, atol=1e-4, rtol=1e-4), float(
        jnp.max(jnp.abs(out_k - ref2)))

    print("KERNEL_OK")
</pallas_src>

<mosaic_0001>
module attributes {stable_mosaic.version = 11 : i64} {
  func.func @_fused_complex_conv_kernel(%arg0: i32, %arg1: i32, %arg2: memref<72x128xf32, #tpu.memory_space<vmem>>, %arg3: memref<16x72xf32, #tpu.memory_space<vmem>>, %arg4: memref<16x1xf32, #tpu.memory_space<vmem>>, %arg5: memref<16x128xf32, #tpu.memory_space<vmem>>, %arg6: memref<16x128xf32, #tpu.memory_space<vmem>>) attributes {dimension_semantics = [#tpu.dimension_semantics<parallel>, #tpu.dimension_semantics<arbitrary>], iteration_bounds = array<i64: 4, 1>, scalar_prefetch = 0 : i64, scratch_operands = 1 : i64, tpu.core_type = #tpu.core_type<tc>, window_params = [{transform_indices = @transform_0, window_bounds = array<i64: 72, 128>}, {transform_indices = @transform_1, window_bounds = array<i64: 16, 72>}, {pipeline_mode = #tpu.pipeline_mode<synchronous>, transform_indices = @transform_2, window_bounds = array<i64: 16, 1>}, {transform_indices = @transform_3, window_bounds = array<i64: 16, 128>}]} {
    %c0_i32 = arith.constant 0 : i32
    %0 = arith.cmpi eq, %arg1, %c0_i32 : i32
    %1 = arith.extui %0 : i1 to i32
    %c0_i32_0 = arith.constant 0 : i32
    %2 = arith.cmpi ne, %1, %c0_i32_0 : i32
    scf.if %2 {
      %cst_10 = arith.constant 0.000000e+00 : f32
      %12 = vector.broadcast %cst_10 : f32 to vector<16x128xf32>
      %c0_11 = arith.constant 0 : index
      %c0_12 = arith.constant 0 : index
      %13 = vector.load %arg6[%c0_11, %c0_12] : memref<16x128xf32, #tpu.memory_space<vmem>>, vector<16x128xf32>
      tpu.vector_store %arg6[%c0_11, %c0_12], %12 {strides = array<i32>} : memref<16x128xf32, #tpu.memory_space<vmem>>, vector<16x128xf32>,
    } else {
    }
    %c0 = arith.constant 0 : index
    %c0_1 = arith.constant 0 : index
    %3 = vector.load %arg6[%c0, %c0_1] : memref<16x128xf32, #tpu.memory_space<vmem>>, vector<16x128xf32>
    %c0_2 = arith.constant 0 : index
    %c0_3 = arith.constant 0 : index
    %4 = vector.load %arg3[%c0_2, %c0_3] : memref<16x72xf32, #tpu.memory_space<vmem>>, vector<16x72xf32>
    %c0_4 = arith.constant 0 : index
    %c0_5 = arith.constant 0 : index
    %5 = vector.load %arg2[%c0_4, %c0_5] : memref<72x128xf32, #tpu.memory_space<vmem>>, vector<72x128xf32>
    %cst = arith.constant dense<0.000000e+00> : vector<16x128xf32>
    %6 = tpu.matmul %4, %5, %cst {dimension_numbers = #tpu.dot_dimension_numbers<[1], [0], [0], [1], [0, 0, 1, 1], [], []>} : vector<16x72xf32>, vector<72x128xf32>, vector<16x128xf32> -> vector<16x128xf32>
    %7 = arith.addf %3, %6 : vector<16x128xf32>
    %c0_6 = arith.constant 0 : index
    %c0_7 = arith.constant 0 : index
    %8 = vector.load %arg6[%c0_6, %c0_7] : memref<16x128xf32, #tpu.memory_space<vmem>>, vector<16x128xf32>
    tpu.vector_store %arg6[%c0_6, %c0_7], %7 {strides = array<i32>} : memref<16x128xf32, #tpu.memory_space<vmem>>, vector<16x128xf32>,
    %c0_i32_8 = arith.constant 0 : i32
    %9 = arith.cmpi eq, %arg1, %c0_i32_8 : i32
    %10 = arith.extui %9 : i1 to i32
    %c0_i32_9 = arith.constant 0 : i32
    %11 = arith.cmpi ne, %10, %c0_i32_9 : i32
    scf.if %11 {
      %c0_10 = arith.constant 0 : index
      %c0_11 = arith.constant 0 : index
      %12 = vector.load %arg6[%c0_10, %c0_11] : memref<16x128xf32, #tpu.memory_space<vmem>>, vector<16x128xf32>
      %c0_12 = arith.constant 0 : index
      %c0_13 = arith.constant 0 : index
      %13 = vector.load %arg4[%c0_12, %c0_13] : memref<16x1xf32, #tpu.memory_space<vmem>>, vector<16x1xf32>
      %14 = vector.broadcast %13 : vector<16x1xf32> to vector<16x128xf32>
      %15 = arith.addf %12, %14 : vector<16x128xf32>
      %c0_14 = arith.constant 0 : index
      %c0_15 = arith.constant 0 : index
      %16 = vector.load %arg5[%c0_14, %c0_15] : memref<16x128xf32, #tpu.memory_space<vmem>>, vector<16x128xf32>
      tpu.vector_store %arg5[%c0_14, %c0_15], %15 {strides = array<i32>} : memref<16x128xf32, #tpu.memory_space<vmem>>, vector<16x128xf32>,
    } else {
    }
    return
  }
  func.func @transform_0(%arg0: i32, %arg1: i32) -> (i32, i32) {
    %c0_i32 = arith.constant 0 : i32
    return %arg1, %arg0 : i32, i32
  }
  func.func @transform_1(%arg0: i32, %arg1: i32) -> (i32, i32) {
    %c0_i32 = arith.constant 0 : i32
    %c0_i32_0 = arith.constant 0 : i32
    return %c0_i32, %arg1 : i32, i32
  }
  func.func @transform_2(%arg0: i32, %arg1: i32) -> (i32, i32) {
    %c0_i32 = arith.constant 0 : i32
    %c0_i32_0 = arith.constant 0 : i32
    %c0_i32_1 = arith.constant 0 : i32
    return %c0_i32, %c0_i32_0 : i32, i32
  }
  func.func @transform_3(%arg0: i32, %arg1: i32) -> (i32, i32) {
    %c0_i32 = arith.constant 0 : i32
    %c0_i32_0 = arith.constant 0 : i32
    return %c0_i32, %arg0 : i32, i32
  }
}

</mosaic_0001>

<bundles_post_ra>
// kernel: neg.1
= control target key start
LH: loop header
LB: loop body
LE: loop exit
PB: predicated region body
PF: predicated region fallthrough
CT: control target
= control target key end

     0   :  { %s24_s0 = inlined_call_operand.vmem [shape: f32[8,36], index: 0, kind: input, shape index: {}]   ;;  %s25_s1 = inlined_call_operand.vmem [shape: f32[8,36], index: 1, kind: output, shape index: {}]  }
   0x1   :  { %v2_v0 = vld [vmem:[%s24_s0] sm:$0xff] }
   0x2   :  { %v5_v1 = vxor.u32 2147483648, %v2_v0 }
   0x4   :  { %7 = vst [vmem:[%s25_s1] sm:$0xff] %v5_v1 }

// kernel: complex_conv2d.1
= control target key start
LH: loop header
LB: loop body
LE: loop exit
PB: predicated region body
PF: predicated region fallthrough
CT: control target
= control target key end

     0   :  { %s672_s12 = smov 0   ;;  %s674_s13 = smov 0   ;;  %s762_s0 = inlined_call_operand.vmem [shape: f32[72,512], index: 0, kind: input, shape index: {}]   ;;  %s763_s1 = inlined_call_operand.vmem [shape: f32[16,72], index: 1, kind: input, shape index: {}]   ;;  %s764_s2 = inlined_call_operand.vmem [shape: f32[16,1], index: 2, kind: input, shape index: {}]   ;;  %s765_s3 = inlined_call_operand.vmem [shape: f32[16,512], index: 3, kind: output, shape index: {}]  }
   0x1   :  { %s676_s14 = smov 0   ;;  %s678_s15 = smov 0  }
   0x2   :  { %s680_s16 = smov 0  }
   0x3 LB: > { %s25_s17 = sadd.s32 1, %s645_s15  ;;  %s521_s18 = sadd.s32 4294967295, %s649_s16   ;;  %s649_s16 = sphi %s680_s16, %s13_s16   ;;  %s645_s15 = sphi %s678_s15, %s770_s15   ;;  %s641_s14 = sphi %s676_s14, %s769_s14   ;;  %s637_s13 = sphi %s674_s13, %s768_s13   ;;  %s633_s12 = sphi %s672_s12, %s767_s12  }
   0x4   : > { %p27_p0 = scmp.ge.s32.totalorder %s25_s17, 4  ;;  %p41_p1 = scmp.ne.s32.totalorder %s637_s13, %s633_s12 }
   0x5   : > { %p42_p2 = scmp.eq.s32.totalorder %s649_s16, 0  ;;  %p118_p4 = scmp.eq.s32.totalorder %s521_s18, 3 }
   0x6   : > { %s772_s17 = smov (%p27_p0, %s25_s17), 0  ;;  %s34_s20 = sadd.s32 1, %s637_s13 }
   0x7   : > { %p43_p3 = por %p42_p2, %p41_p1  ;;  %s30_s19 = ssub.s32 %s645_s15, %s772_s17 }
   0x8   : > { %p32_p5 = scmp.eq.s32.totalorder %s30_s19, 0  ;;  %p707_p6 = por %p118_p4, %p41_p1 }
   0x9   : > { %p525_p7 = scmp.ge.s32.totalorder %s649_s16, 4 }
   0xa   : > { %s712_s22 = scalar_select %p32_p5, %s637_s13, %s34_s20  }
   0xb   : > { %150 = sbr.rel (%p525_p7) target bundleno = 29 (0x1d), region = 24 }
  0x10   : > { %153 = sbr.rel (!%p43_p3) target bundleno = 29 (0x1d), region = 28  ;;  %s155_s23 = sand.u32 (%p43_p3), 1, %s637_s13  }
  0x11   : > { %s526_s24 = sshll.u32 (%p43_p3), %s645_s15, 3  ;;  %s567_s25 = smul.u32 (%p43_p3), 72, %s155_s23 }
  0x12   : > { %s162_s28 = scalar_lea.vmem (%p43_p3), %s762_s0, %s526_s24 }
  0x13   : > { %v207_v0 = vld [vmem:[%s162_s28] sm:$0xff] (%p43_p3)  ;;  %s157_s29 = scalar_lea.vmem (%p43_p3), [#allocation3], %s567_s25 }
  0x14   : > { %v209_v1 = vld [vmem:[%s162_s28 + $0x20] sm:$0xff] (%p43_p3)  ;;  %208 = vst [vmem:[%s157_s29] sm:$0xff] (%p43_p3), %v207_v0 }
  0x15   : > { %v211_v2 = vld [vmem:[%s162_s28 + $0x40] sm:$0xff]  ;;  %210 = vst [vmem:[%s157_s29 + $0x8] sm:$0xff] %v209_v1 }
  0x16   : > { %v213_v3 = vld [vmem:[%s162_s28 + $0x60] sm:$0xff]  ;;  %212 = vst [vmem:[%s157_s29 + $0x10] sm:$0xff] %v211_v2 }
  0x17   : > { %v215_v4 = vld [vmem:[%s162_s28 + $0x80] sm:$0xff]  ;;  %214 = vst [vmem:[%s157_s29 + $0x18] sm:$0xff] %v213_v3 }
  0x18   : > { %v217_v5 = vld [vmem:[%s162_s28 + $0xa0] sm:$0xff]  ;;  %216 = vst [vmem:[%s157_s29 + $0x20] sm:$0xff] %v215_v4 }
  0x19   : > { %218 = vst [vmem:[%s157_s29 + $0x28] sm:$0xff] %v217_v5  ;;  %v219_v6 = vld [vmem:[%s162_s28 + $0xc0] sm:$0xff] }
  0x1a   : > { %v221_v7 = vld [vmem:[%s162_s28 + $0xe0] sm:$0xff]  ;;  %220 = vst [vmem:[%s157_s29 + $0x30] sm:$0xff] %v219_v6 }
  0x1b   : > { %v223_v8 = vld [vmem:[%s162_s28 + $0x100] sm:$0xff]  ;;  %222 = vst [vmem:[%s157_s29 + $0x38] sm:$0xff] %v221_v7 }
  0x1c   : > { %224 = vst [vmem:[%s157_s29 + $0x40] sm:$0xff] %v223_v8 }
  0x1d PF: > { %p527_p8 = scmp.ge.s32.totalorder %s649_s16, 1  ;;  %p229_p9 = scmp.lt.s32.totalorder %s649_s16, 5 }
  0x1f   : > { %p230_p10 = pnand %p527_p8, %p229_p9 }
  0x20   : > { %s236_s30 = sand.u32 (!%p230_p10), 1, %s633_s12  }
  0x21   : > { %233 = sbr.rel (%p230_p10) target bundleno = 265 (0x109), region = 66  ;;  %s528_s20 = sshll.u32 (!%p230_p10), %s236_s30, 4 }
  0x22   : > { %s568_s8 = smul.u32 (!%p230_p10), 72, %s236_s30  ;;  %s261_s23 = scalar_lea.vmem (!%p230_p10), [#allocation4], %s528_s20 }
  0x24   : > { %s238_s11 = scalar_lea.vmem (!%p230_p10), [#allocation3], %s568_s8 }
  0x26   : > { %v275_v9 = vld [vmem:[%s763_s1] sm:$0xff]  ;;  %vm286_vm0 = vcmask 588800   ;;  %v651_v11 = vmov 0   ;;  %v378_v12 = vld [vmem:[%s764_s2 + $0x8] sm:$0xff]  ;;  %v283_v15 = vld [vmem:[%s238_s11 + $0x30] sm:$0xff]  ;;  %s532_s24 = sshll.u32 (%p707_p6), %s641_s14, 3 }
  0x27   : > { %v377_v10 = vld [vmem:[%s764_s2] sm:$0xff]  ;;  %564 = vmatprep.mubr.msk.f32.mxu0 %vm286_vm0, %v275_v9  ;;  %610 = vset.pattern.permute.xlu0 %v651_v11  ;;  %v282_v16 = vld [vmem:[%s238_s11 + $0x28] sm:$0xff]  ;;  %v279_v19 = vld [vmem:[%s238_s11 + $0x10] sm:$0xff]  ;;  %s401_s12 = scalar_lea.vmem (%p707_p6), %s765_s3, %s532_s24 }
  0x28   : > { %381 = vperm.xlu0 %610, %v377_v10   ;;  %v285_v13 = vld [vmem:[%s238_s11 + $0x40] sm:$0xff]  ;;  %v284_v14 = vld [vmem:[%s238_s11 + $0x38] sm:$0xff]  ;;  %v278_v20 = vld [vmem:[%s238_s11 + $0x8] sm:$0xff] }
  0x29   : > { %546 = vmatprep.subr.mxu0 %v285_v13  ;;  %v281_v17 = vld [vmem:[%s238_s11 + $0x20] sm:$0xff]  ;;  %v280_v18 = vld [vmem:[%s238_s11 + $0x18] sm:$0xff] }
  0x2a   : > { %547 = vmatpush3.msra.mxu0 %v285_v13  ;;  %v277_v21 = vld [vmem:[%s238_s11] sm:$0xff] }
  0x2b   : > { %548 = vmatprep.subr.mxu0 %v284_v14  ;;  %v276_v22 = vld [vmem:[%s763_s1 + $0x8] sm:$0xff] }
  0x2c   : > { %386 = vperm.xlu0 %610, %v378_v12   ;;  %549 = vmatpush3.msra.mxu0 %v284_v14 }
  0x2d   : > { %550 = vmatprep.subr.mxu0 %v283_v15 }
  0x2e   : > { %551 = vmatpush3.msra.mxu0 %v283_v15 }
  0x2f   : > { %552 = vmatprep.subr.mxu0 %v282_v16 }
  0x30   : > { %553 = vmatpush3.msra.mxu0 %v282_v16 }
  0x31   : > { %554 = vmatprep.subr.mxu0 %v281_v17 }
  0x32   : > { %555 = vmatpush3.msra.mxu0 %v281_v17 }
  0x33   : > { %556 = vmatprep.subr.mxu0 %v280_v18 }
  0x34   : > { %557 = vmatpush3.msra.mxu0 %v280_v18 }
  0x35   : > { %558 = vmatprep.subr.mxu0 %v279_v19 }
  0x36   : > { %559 = vmatpush3.msra.mxu0 %v279_v19 }
  0x37   : > { %560 = vmatprep.subr.mxu0 %v278_v20 }
  0x38   : > { %561 = vmatpush3.msra.mxu0 %v278_v20 }
  0x39   : > { %562 = vmatprep.subr.mxu0 %v277_v21 }
  0x3a   : > { %563 = vmatpush3.msra.mxu0 %v277_v21 }
  0x3b   : > { %565 = vmatmul.mubr.msk.f32.vlgmr.msra.gmra.mxu0 %vm286_vm0, %v276_v22 }
  0xa3   : > { %v382_v23 = vpop.permute.xlu0 %381 }
  0xa7   : > { %v387_v24 = vpop.permute.xlu0 %386 }
  0xfb   : > { %v566_v25 = vpop.f32.mrf.mxu0 }
  0xfc   : > { %v390_v26 = vadd.f32 %v566_v25, %v387_v24  ;;  %399 = sbr.rel (!%p707_p6) target bundleno = 265 (0x109), region = 82 }
  0xfd   : > { %v359_v27 = vpop.f32.mrf.mxu0 }
  0xfe   : > { %392 = vst [vmem:[%s261_s23 + $0x8] sm:$0xff] %v390_v26  ;;  %v389_v28 = vadd.f32 %v382_v23, %v359_v27 }
 0x100   : > { %391 = vst [vmem:[%s261_s23] sm:$0xff] %v389_v28 }
 0x105   : > { %v434_v30 = vld [vmem:[%s261_s23 + $0x8] sm:$0xff] }
 0x106   : > { %435 = vst [vmem:[%s401_s12 + $0x20] sm:$0xff] %v434_v30 }
 0x107   : > { %v432_v29 = vld [vmem:[%s261_s23] sm:$0xff] }
 0x108   : > { %433 = vst [vmem:[%s401_s12] sm:$0xff] %v432_v29 }
 0x109 PF: > { %s13_s16 = sadd.s32 1, %s649_s16   ;;  %s767_s12 = smov %s637_s13 }
 0x10a   : > { %p10_p11 = scmp.ge.s32.totalorder %s13_s16, 6   ;;  %s768_s13 = smov %s712_s22 }
 0x10b   : > { %s769_s14 = smov %s645_s15  ;;  %s770_s15 = smov %s772_s17 }
 0x10c   :  { %12 = sbr.rel (!%p10_p11) target bundleno = 3 (0x3), region = 154 }

</bundles_post_ra>
